<compile_context>
chip_gen: v7x
topology: tpu7x:2x2x1
jax: 0.10.0
libtpu: 0.0.40
codegen_flags: <defaults>
</compile_context>

<pallas_src>
import functools

import jax
import jax.numpy as jnp
from jax.experimental import pallas as pl
from jax.experimental.pallas import tpu as pltpu


# ----------------------------- fused Pallas kernel ---------------------------

def fused_forward_kernel(a_ref, w_enc_ref, w1_ref, b1_ref, w2_ref, b2_ref,
                         feat_out_ref, logit_ref, *, bs, S):
    # --- synthetic frozen encoder: patchify conv (as matmul) + ReLU ----------
    # a_ref: (bs*S, Kp) bf16, w_enc_ref: (Kp, nc) bf16, f32 accumulation (MXU).
    enc = jnp.dot(a_ref[...], w_enc_ref[...],
                  preferred_element_type=jnp.float32)            # (bs*S, nc)
    enc = jnp.maximum(enc, 0.0)

    # --- AdaptiveConcatPool2d + Flatten ---------------------------------------
    # The reference pools over the (n*w2, h2) spatial extent of the regrouped
    # (bs, ch2, n*w2, h2) tensor; max/mean are permutation-invariant over the
    # S = n*w2*h2 positions, so we reduce row-blocks of `enc` directly and skip
    # the view/permute/view chain entirely.
    pooled_rows = []
    for b in range(bs):                                          # bs is tiny & static
        blk = enc[b * S:(b + 1) * S, :]                          # (S, nc), static slice
        mx = jnp.max(blk, axis=0, keepdims=True)                 # (1, nc)
        avg = jnp.mean(blk, axis=0, keepdims=True)               # (1, nc)
        pooled_rows.append(jnp.concatenate([mx, avg], axis=-1))  # fastai order [max, avg]
    pooled = jnp.concatenate(pooled_rows, axis=0)                # (bs, 2*nc)

    # --- head: Linear(2*nc, 512) + ReLU ---------------------------------------
    h = jnp.dot(pooled, w1_ref[...], preferred_element_type=jnp.float32)
    h = jnp.maximum(h + b1_ref[...], 0.0)
    feat_out_ref[...] = h                                        # feature_output

    # --- fc: Linear(512, num_classes) -----------------------------------------
    logit_ref[...] = (jnp.dot(h, w2_ref[...], preferred_element_type=jnp.float32)
                      + b2_ref[...])


# ------------------------------ pallas_call wrapper ---------------------------

def fused_forward_call(a, w_enc, w1, b1, w2, b2, *, bs, S):
    hidden = w1.shape[1]
    num_classes = w2.shape[1]
    vmem = pl.BlockSpec(memory_space=pltpu.MemorySpace.VMEM)
    # Single-block kernel: total VMEM footprint is ~0.3 MiB, far below every
    # generation's budget (v5e/v6e 128 MiB, v7x 64 MiB), so no grid is needed.
    # TODO(synk): if bs*n*w2*h2 grows, reintroduce a ("parallel",) grid axis over
    # the row dim of `a` so v7x's second TensorCore can share the encoder matmul.
    return pl.pallas_call(
        functools.partial(fused_forward_kernel, bs=bs, S=S),
        out_shape=(jax.ShapeDtypeStruct((bs, hidden), jnp.float32),
                   jax.ShapeDtypeStruct((bs, num_classes), jnp.float32)),
        in_specs=[vmem, vmem, vmem, vmem, vmem, vmem],
        out_specs=(vmem, vmem),
    )(a, w_enc, w1, b1, w2, b2)


# ------------------------------- forward pass ---------------------------------

def _patchify(x, Kp):
    """x: (bs, n, ch, w, h) -> 2x2 stride-2 patch rows (bs*n*w2*h2, Kp) bf16."""
    bs, n, ch, w, h = x.shape
    w2, h2 = w // 2, h // 2
    # x.view(bs*n, ch, w, h) + channels-last patch extraction
    xi = x.reshape(bs * n, ch, w, h).transpose(0, 2, 3, 1)                  # NHWC
    patches = xi.reshape(bs * n, w2, 2, h2, 2, ch).transpose(0, 1, 3, 2, 4, 5)
    patches = patches.reshape(bs * n * w2 * h2, 4 * ch)                     # (M, 12)
    patches = jnp.pad(patches, ((0, 0), (0, Kp - 4 * ch)))                  # 12 -> 16 only
    return patches.astype(jnp.bfloat16), (bs, n, w2, h2)


def multi_instance_forward(x, params):
    a, (bs, n, w2, h2) = _patchify(x, params["w_enc"].shape[0])
    S = n * w2 * h2
    return fused_forward_call(a, params["w_enc"], params["w1"], params["b1"],
                              params["w2"], params["b2"], bs=bs, S=S)


def reference_forward(x, params):
    """Pure-JAX reference that follows the PyTorch view/permute chain exactly."""
    a, (bs, n, w2, h2) = _patchify(x, params["w_enc"].shape[0])
    enc = jnp.maximum(
        a.astype(jnp.float32) @ params["w_enc"].astype(jnp.float32), 0.0)   # (bs*n*w2*h2, nc)
    nc = enc.shape[-1]
    enc = enc.reshape(bs * n, w2, h2, nc).transpose(0, 3, 1, 2)             # (bs*n, nc, w2, h2)
    feat = enc.reshape(bs, n, nc, w2, h2).transpose(0, 2, 1, 3, 4)          # permute(0,2,1,3,4)
    feat = feat.reshape(bs, nc, n * w2, h2)                                 # view(bs, ch2, n*w2, h2)
    avg = jnp.mean(feat, axis=(-2, -1))                                     # AdaptiveAvgPool2d(1)
    mx = jnp.max(feat, axis=(-2, -1))                                       # AdaptiveMaxPool2d(1)
    pooled = jnp.concatenate([mx, avg], axis=-1)                            # AdaptiveConcatPool2d
    h = jnp.maximum(pooled @ params["w1"] + params["b1"], 0.0)
    logits = h @ params["w2"] + params["b2"]
    return h, logits


# ----------------------------------- main --------------------------------------

if __name__ == "__main__":
    key = jax.random.PRNGKey(0)
    bs, n, ch, w, h = 2, 4, 3, 16, 16          # x: (bs, n, ch, w, h)
    nc = 32                                    # synthetic encoder output channels
    hidden = 512                               # nn.Linear(2*nc, 512)
    num_classes = 2                            # nn.Linear(512, num_classes)
    Kp = 16                                    # 4*ch=12 padded only to bf16 sublane pack

    k_x, k_we, k_w1, k_b1, k_w2, k_b2 = jax.random.split(key, 6)
    x = jax.random.normal(k_x, (bs, n, ch, w, h), dtype=jnp.float32)

    # Deterministic synthetic parameters (PyTorch Linear stores (out,in); we keep (in,out)).
    w_enc_raw = 0.05 * jax.random.normal(k_we, (4 * ch, nc), dtype=jnp.float32)
    w_enc = jnp.zeros((Kp, nc), jnp.float32).at[:4 * ch, :].set(w_enc_raw)
    params = {
        "w_enc": w_enc.astype(jnp.bfloat16),
        "w1": 0.05 * jax.random.normal(k_w1, (2 * nc, hidden), dtype=jnp.float32),
        "b1": 0.01 * jax.random.normal(k_b1, (1, hidden), dtype=jnp.float32),
        "w2": 0.05 * jax.random.normal(k_w2, (hidden, num_classes), dtype=jnp.float32),
        "b2": 0.01 * jax.random.normal(k_b2, (1, num_classes), dtype=jnp.float32),
    }

    feature_output, logits = multi_instance_forward(x, params)
    jax.block_until_ready((feature_output, logits))

    ref_feat, ref_logits = reference_forward(x, params)
    assert feature_output.shape == (bs, hidden) and logits.shape == (bs, num_classes)
    assert jnp.allclose(feature_output, ref_feat, rtol=1e-2, atol=1e-2)
    assert jnp.allclose(logits, ref_logits, rtol=1e-2, atol=1e-2)

    print("KERNEL_OK")
</pallas_src>

<mosaic_0001>
module attributes {stable_mosaic.version = 11 : i64} {
  func.func @fused_forward_kernel(%arg0: memref<512x16xbf16, #tpu.memory_space<vmem>>, %arg1: memref<16x32xbf16, #tpu.memory_space<vmem>>, %arg2: memref<64x512xf32, #tpu.memory_space<vmem>>, %arg3: memref<1x512xf32, #tpu.memory_space<vmem>>, %arg4: memref<512x2xf32, #tpu.memory_space<vmem>>, %arg5: memref<1x2xf32, #tpu.memory_space<vmem>>, %arg6: memref<2x512xf32, #tpu.memory_space<vmem>>, %arg7: memref<2x2xf32, #tpu.memory_space<vmem>>) attributes {dimension_semantics = [], scalar_prefetch = 0 : i64, scratch_operands = 0 : i64, tpu.core_type = #tpu.core_type<tc>} {
    %c0 = arith.constant 0 : index
    %c0_0 = arith.constant 0 : index
    %0 = vector.load %arg0[%c0, %c0_0] : memref<512x16xbf16, #tpu.memory_space<vmem>>, vector<512x16xbf16>
    %c0_1 = arith.constant 0 : index
    %c0_2 = arith.constant 0 : index
    %1 = vector.load %arg1[%c0_1, %c0_2] : memref<16x32xbf16, #tpu.memory_space<vmem>>, vector<16x32xbf16>
    %cst = arith.constant dense<0.000000e+00> : vector<512x32xf32>
    %2 = tpu.matmul %0, %1, %cst {dimension_numbers = #tpu.dot_dimension_numbers<[1], [0], [0], [1], [0, 0, 1, 1], [], []>} : vector<512x16xbf16>, vector<16x32xbf16>, vector<512x32xf32> -> vector<512x32xf32>
    %cst_3 = arith.constant 0.000000e+00 : f32
    %3 = vector.broadcast %cst_3 : f32 to vector<512x32xf32>
    %4 = arith.maximumf %2, %3 : vector<512x32xf32>
    %5 = vector.extract_strided_slice %4 {offsets = [0, 0], sizes = [256, 32], strides = [1, 1]} : vector<512x32xf32> to vector<256x32xf32>
    %cst_4 = arith.constant dense<0xFF800000> : vector<32xf32>
    %6 = vector.multi_reduction <maximumf>, %5, %cst_4 [0] : vector<256x32xf32> to vector<32xf32>
    %7 = vector.shape_cast %6 : vector<32xf32> to vector<1x32xf32>
    %cst_5 = arith.constant dense<0.000000e+00> : vector<32xf32>
    %8 = vector.multi_reduction <add>, %5, %cst_5 [0] : vector<256x32xf32> to vector<32xf32>
    %9 = vector.shape_cast %8 : vector<32xf32> to vector<1x32xf32>
    %cst_6 = arith.constant 2.560000e+02 : f32
    %10 = vector.broadcast %cst_6 : f32 to vector<1x32xf32>
    %11 = arith.divf %9, %10 : vector<1x32xf32>
    %12 = tpu.concatenate %7, %11 in 1 : vector<1x32xf32>, vector<1x32xf32> -> vector<1x64xf32>
    %13 = vector.extract_strided_slice %4 {offsets = [256, 0], sizes = [256, 32], strides = [1, 1]} : vector<512x32xf32> to vector<256x32xf32>
    %cst_7 = arith.constant dense<0xFF800000> : vector<32xf32>
    %14 = vector.multi_reduction <maximumf>, %13, %cst_7 [0] : vector<256x32xf32> to vector<32xf32>
    %15 = vector.shape_cast %14 : vector<32xf32> to vector<1x32xf32>
    %cst_8 = arith.constant dense<0.000000e+00> : vector<32xf32>
    %16 = vector.multi_reduction <add>, %13, %cst_8 [0] : vector<256x32xf32> to vector<32xf32>
    %17 = vector.shape_cast %16 : vector<32xf32> to vector<1x32xf32>
    %cst_9 = arith.constant 2.560000e+02 : f32
    %18 = vector.broadcast %cst_9 : f32 to vector<1x32xf32>
    %19 = arith.divf %17, %18 : vector<1x32xf32>
    %20 = tpu.concatenate %15, %19 in 1 : vector<1x32xf32>, vector<1x32xf32> -> vector<1x64xf32>
    %21 = tpu.concatenate %12, %20 in 0 : vector<1x64xf32>, vector<1x64xf32> -> vector<2x64xf32>
    %c0_10 = arith.constant 0 : index
    %c0_11 = arith.constant 0 : index
    %22 = vector.load %arg2[%c0_10, %c0_11] : memref<64x512xf32, #tpu.memory_space<vmem>>, vector<64x512xf32>
    %cst_12 = arith.constant dense<0.000000e+00> : vector<2x512xf32>
    %23 = tpu.matmul %21, %22, %cst_12 {dimension_numbers = #tpu.dot_dimension_numbers<[1], [0], [0], [1], [0, 0, 1, 1], [], []>} : vector<2x64xf32>, vector<64x512xf32>, vector<2x512xf32> -> vector<2x512xf32>
    %c0_13 = arith.constant 0 : index
    %c0_14 = arith.constant 0 : index
    %24 = vector.load %arg3[%c0_13, %c0_14] : memref<1x512xf32, #tpu.memory_space<vmem>>, vector<1x512xf32>
    %25 = vector.broadcast %24 : vector<1x512xf32> to vector<2x512xf32>
    %26 = arith.addf %23, %25 : vector<2x512xf32>
    %cst_15 = arith.constant 0.000000e+00 : f32
    %27 = vector.broadcast %cst_15 : f32 to vector<2x512xf32>
    %28 = arith.maximumf %26, %27 : vector<2x512xf32>
    %c0_16 = arith.constant 0 : index
    %c0_17 = arith.constant 0 : index
    %29 = vector.load %arg6[%c0_16, %c0_17] : memref<2x512xf32, #tpu.memory_space<vmem>>, vector<2x512xf32>
    tpu.vector_store %arg6[%c0_16, %c0_17], %28 {strides = array<i32>} : memref<2x512xf32, #tpu.memory_space<vmem>>, vector<2x512xf32>,
    %c0_18 = arith.constant 0 : index
    %c0_19 = arith.constant 0 : index
    %30 = vector.load %arg4[%c0_18, %c0_19] : memref<512x2xf32, #tpu.memory_space<vmem>>, vector<512x2xf32>
    %cst_20 = arith.constant dense<0.000000e+00> : vector<2x2xf32>
    %31 = tpu.matmul %28, %30, %cst_20 {dimension_numbers = #tpu.dot_dimension_numbers<[1], [0], [0], [1], [0, 0, 1, 1], [], []>} : vector<2x512xf32>, vector<512x2xf32>, vector<2x2xf32> -> vector<2x2xf32>
    %c0_21 = arith.constant 0 : index
    %c0_22 = arith.constant 0 : index
    %32 = vector.load %arg5[%c0_21, %c0_22] : memref<1x2xf32, #tpu.memory_space<vmem>>, vector<1x2xf32>
    %33 = vector.broadcast %32 : vector<1x2xf32> to vector<2x2xf32>
    %34 = arith.addf %31, %33 : vector<2x2xf32>
    %c0_23 = arith.constant 0 : index
    %c0_24 = arith.constant 0 : index
    %35 = vector.load %arg7[%c0_23, %c0_24] : memref<2x2xf32, #tpu.memory_space<vmem>>, vector<2x2xf32>
    tpu.vector_store %arg7[%c0_23, %c0_24], %34 {strides = array<i32>} : memref<2x2xf32, #tpu.memory_space<vmem>>, vector<2x2xf32>,
    return
  }
}

</mosaic_0001>

<bundles_post_ra>
// kernel: tpu_custom_call.1
= control target key start
LH: loop header
LB: loop body
LE: loop exit
PB: predicated region body
PF: predicated region fallthrough
CT: control target
= control target key end

     0   :  { %13 = vsyncpa [#allocation3], 0  ;;  %vm260_vm0 = vcmask 130048   ;;  %s2590_s0 = inlined_call_operand.vmem [shape: bf16[512,16], index: 0, kind: input, shape index: {}]   ;;  %s2591_s1 = inlined_call_operand.vmem [shape: bf16[16,32], index: 1, kind: input, shape index: {}]   ;;  %s2592_s2 = inlined_call_operand.vmem [shape: f32[64,512], index: 2, kind: input, shape index: {}]   ;;  %s2593_s3 = inlined_call_operand.vmem [shape: f32[1,512], index: 3, kind: input, shape index: {}]   ;;  %s2594_s4 = inlined_call_operand.vmem [shape: f32[512,2], index: 4, kind: input, shape index: {}]   ;;  %s2595_s5 = inlined_call_operand.vmem [shape: f32[1,2], index: 5, kind: input, shape index: {}]   ;;  %s2596_s6 = inlined_call_operand.hbm [shape: f32[2,512], index: 6, kind: output, shape index: {0}]   ;;  %s2597_s7 = inlined_call_operand.hbm [shape: f32[2,2], index: 7, kind: output, shape index: {1}]  }
   0x1   :  { %v1813_v0 = vld [vmem:[%s2591_s1] sm:$0xff]   ;;  %v1815_v2 = vld [vmem:[%s2590_s0 + $0x8] sm:$0xff]   ;;  %v1816_v3 = vld [vmem:[%s2590_s0 + $0x10] sm:$0xff]  }
   0x2   :  { %v1814_v1 = vld [vmem:[%s2590_s0] sm:$0xff]   ;;  %1644 = vmatprep.subr.bf16.mxu0 %v1813_v0  ;;  %1806 = vmatprep.subr.bf16.mxu1 %v1813_v0  ;;  %v1817_v4 = vld [vmem:[%s2590_s0 + $0x18] sm:$0xff]   ;;  %v1819_v6 = vld [vmem:[%s2590_s0 + $0x28] sm:$0xff]  }
   0x3   :  { %1645 = vmatpush3.bf16.msra.mxu0 %v1813_v0  ;;  %1646 = vmatprep.mubr.msk.bf16.mxu0 %vm260_vm0, %v1814_v1  ;;  %v1818_v5 = vld [vmem:[%s2590_s0 + $0x20] sm:$0xff]   ;;  %v1820_v7 = vld [vmem:[%s2590_s0 + $0x30] sm:$0xff]   ;;  %v1821_v8 = vld [vmem:[%s2590_s0 + $0x38] sm:$0xff]  }
   0x4   :  { %1807 = vmatpush3.bf16.msra.mxu1 %v1813_v0  ;;  %v1822_v9 = vld [vmem:[%s2590_s0 + $0x40] sm:$0xff]   ;;  %v1841_v11 = vld [vmem:[%s2590_s0 + $0xe8] sm:$0xff]   ;;  %v1844_v12 = vld [vmem:[%s2590_s0 + $0xf0] sm:$0xff]  }
   0x5   :  { %v1840_v10 = vld [vmem:[%s2590_s0 + $0xe0] sm:$0xff]  }
   0x6   :  { %1647 = vmatmul.mubr.msk.bf16.vlgmr.msra.gmra.mrb[0].mxu0 %vm260_vm0, %v1815_v2  ;;  %1702 = vmatprep.mubr.msk.bf16.mxu1 %vm260_vm0, %v1840_v10 }
   0x7   :  { %1650 = vmatprep.mubr.msk.bf16.mxu0 %vm260_vm0, %v1816_v3  ;;  %1703 = vmatmul.mubr.msk.bf16.vlgmr.msra.gmra.mrb[0].mxu1 %vm260_vm0, %v1841_v11 }
   0x8   :  { %1706 = vmatprep.mubr.msk.bf16.mxu1 %vm260_vm0, %v1844_v12 }
   0xe   :  { %1651 = vmatmul.mubr.msk.bf16.gmra.mrb[4].mxu0 %vm260_vm0, %v1817_v4 }
   0xf   :  { %1654 = vmatprep.mubr.msk.bf16.mxu0 %vm260_vm0, %v1818_v5 }
  0x16   :  { %1655 = vmatmul.mubr.msk.bf16.gmra.mrb[8].mxu0 %vm260_vm0, %v1819_v6 }
  0x17   :  { %1658 = vmatprep.mubr.msk.bf16.mxu0 %vm260_vm0, %v1820_v7 }
  0x1e   :  { %1659 = vmatmul.mubr.msk.bf16.gmra.mrb[12].mxu0 %vm260_vm0, %v1821_v8 }
  0x1f   :  { %1662 = vmatprep.mubr.msk.bf16.mxu0 %vm260_vm0, %v1822_v9 }
  0x20   :  { %14 = vsyncpa [#allocation5], 0  ;;  %v1823_v13 = vld [vmem:[%s2590_s0 + $0x48] sm:$0xff]   ;;  %v1845_v14 = vld [vmem:[%s2590_s0 + $0xf8] sm:$0xff]   ;;  %vm710_vm1 = vcmask 261120   ;;  %s1895_s28 = smov 32  }
  0x21   :  { %v1824_v15 = vld [vmem:[%s2590_s0 + $0x50] sm:$0xff]   ;;  %1707 = vmatmul.mubr.msk.bf16.gmra.mrb[4].mxu1 %vm260_vm0, %v1845_v14  ;;  %v1825_v16 = vld [vmem:[%s2590_s0 + $0x58] sm:$0xff]   ;;  %v1826_v17 = vld [vmem:[%s2590_s0 + $0x60] sm:$0xff]   ;;  %vm1003_vm2 = vcmask 1040384   ;;  %vm1059_vm3 = vcmask 523264  }
  0x22   :  { %v1827_v18 = vld [vmem:[%s2590_s0 + $0x68] sm:$0xff]   ;;  %v1828_v19 = vld [vmem:[%s2590_s0 + $0x70] sm:$0xff]   ;;  %v1829_v20 = vld [vmem:[%s2590_s0 + $0x78] sm:$0xff]  }
  0x23   :  { %v1830_v21 = vld [vmem:[%s2590_s0 + $0x80] sm:$0xff]   ;;  %v1831_v22 = vld [vmem:[%s2590_s0 + $0x88] sm:$0xff]   ;;  %v1832_v23 = vld [vmem:[%s2590_s0 + $0x90] sm:$0xff]  }
  0x24   :  { %v1833_v24 = vld [vmem:[%s2590_s0 + $0x98] sm:$0xff]   ;;  %v1834_v25 = vld [vmem:[%s2590_s0 + $0xa0] sm:$0xff]   ;;  %v1835_v26 = vld [vmem:[%s2590_s0 + $0xa8] sm:$0xff]  }
  0x25   :  { %v1836_v27 = vld [vmem:[%s2590_s0 + $0xb0] sm:$0xff]   ;;  %v1837_v28 = vld [vmem:[%s2590_s0 + $0xb8] sm:$0xff]   ;;  %v1838_v29 = vld [vmem:[%s2590_s0 + $0xc0] sm:$0xff]  }
  0x26   :  { %1663 = vmatmul.mubr.msk.bf16.gmra.mrb[16].mxu0 %vm260_vm0, %v1823_v13  ;;  %v1839_v30 = vld [vmem:[%s2590_s0 + $0xc8] sm:$0xff]   ;;  %v1842_v31 = vld [vmem:[%s2590_s0 + $0xd0] sm:$0xff]   ;;  %v1843_v32 = vld [vmem:[%s2590_s0 + $0xd8] sm:$0xff]  }
  0x27   :  { %1666 = vmatprep.mubr.msk.bf16.mxu0 %vm260_vm0, %v1824_v15 }
  0x2e   :  { %1667 = vmatmul.mubr.msk.bf16.gmra.mrb[20].mxu0 %vm260_vm0, %v1825_v16 }
  0x2f   :  { %1670 = vmatprep.mubr.msk.bf16.mxu0 %vm260_vm0, %v1826_v17 }
  0x36   :  { %1671 = vmatmul.mubr.msk.bf16.gmra.mrb[24].mxu0 %vm260_vm0, %v1827_v18 }
  0x37   :  { %1674 = vmatprep.mubr.msk.bf16.mxu0 %vm260_vm0, %v1828_v19 }
  0x3e   :  { %1675 = vmatmul.mubr.msk.bf16.gmra.mrb[28].mxu0 %vm260_vm0, %v1829_v20 }
  0x3f   :  { %1678 = vmatprep.mubr.msk.bf16.mxu0 %vm260_vm0, %v1830_v21 }
  0x46   :  { %1679 = vmatmul.mubr.msk.bf16.gmra.mrb[32].mxu0 %vm260_vm0, %v1831_v22 }
  0x47   :  { %1682 = vmatprep.mubr.msk.bf16.mxu0 %vm260_vm0, %v1832_v23 }
  0x4e   :  { %1683 = vmatmul.mubr.msk.bf16.gmra.mrb[36].mxu0 %vm260_vm0, %v1833_v24 }
  0x4f   :  { %1686 = vmatprep.mubr.msk.bf16.mxu0 %vm260_vm0, %v1834_v25 }
  0x56   :  { %1687 = vmatmul.mubr.msk.bf16.gmra.mrb[40].mxu0 %vm260_vm0, %v1835_v26 }
  0x57   :  { %1690 = vmatprep.mubr.msk.bf16.mxu0 %vm260_vm0, %v1836_v27 }
  0x5e   :  { %1691 = vmatmul.mubr.msk.bf16.gmra.mrb[44].mxu0 %vm260_vm0, %v1837_v28 }
  0x5f   :  { %1694 = vmatprep.mubr.msk.bf16.mxu0 %vm260_vm0, %v1838_v29 }
  0x66   :  { %1695 = vmatmul.mubr.msk.bf16.gmra.mrb[48].mxu0 %vm260_vm0, %v1839_v30 }
  0x67   :  { %1698 = vmatprep.mubr.msk.bf16.mxu0 %vm260_vm0, %v1842_v31 }
  0x6e   :  { %1699 = vmatmul.mubr.msk.bf16.gmra.mrb[52].mxu0 %vm260_vm0, %v1843_v32  ;;  %v1006_v32 = vld [vmem:[%s2592_s2 + $0x8] sm:$0xff] }
  0xd9   :  { %v1648_v33 = vpop.f32.mrb[0].mxu0 }
  0xda   :  { %v391_v34 = vpop.f32.mrb[1].mxu0  ;;  %v648_v38 = vmax.f32 %v1648_v33, 0.0  ;;  %v1010_v33 = vld [vmem:[%s2592_s2 + $0x28] sm:$0xff] }
  0xdb   :  { %v646_v35 = vmax.f32 %v391_v34, 0.0  ;;  %v1649_v36 = vpop.f32.mrb[2].mxu0  ;;  %v1005_v34 = vld [vmem:[%s2592_s2] sm:$0xff] }
  0xdc   :  { %v394_v37 = vpop.f32.mrb[3].mxu0  ;;  %v649_v41 = vmax.f32 %v1649_v36, 0.0  ;;  %v783_v44 = vsel %vm710_vm1, %v648_v38, 0.0  ;;  %v713_v49 = vsel %vm710_vm1, %v648_v38, -inf  ;;  %v1710_v38 = vpack.c.bf16 %v1010_v33, %v1006_v32 }
  0xdd   :  { %v647_v39 = vmax.f32 %v394_v37, 0.0  ;;  %v780_v40 = vsel %vm710_vm1, %v646_v35, 0.0  ;;  %v711_v53 = vsel %vm710_vm1, %v646_v35, -inf  ;;  %v2110_v37 = vpop.f32.mrb[0].mxu1 }
  0xde   :  { %v785_v50 = vsel %vm710_vm1, %v649_v41, 0.0  ;;  %v714_v62 = vsel %vm710_vm1, %v649_v41, -inf  ;;  %v1018_v41 = vld [vmem:[%s2592_s2 + $0x68] sm:$0xff]  ;;  %1711 = vmatprep.subr.bf16.mxu1 %v1710_v38 }
  0xdf   :  { %v781_v42 = vsel %vm710_vm1, %v647_v39, 0.0  ;;  %v712_v2 = vsel %vm710_vm1, %v647_v39, -inf  ;;  %v1009_v39 = vld [vmem:[%s2592_s2 + $0x20] sm:$0xff] }
  0xe0   :  { %v782_v43 = vadd.f32 %v781_v42, %v780_v40  ;;  %v1014_v40 = vld [vmem:[%s2592_s2 + $0x48] sm:$0xff] }
  0xe1   :  { %v1652_v45 = vpop.f32.mrb[4].mxu0 }
  0xe2   :  { %v784_v46 = vadd.f32 %v783_v44, %v782_v43  ;;  %v652_v47 = vmax.f32 %v1652_v45, 0.0  ;;  %v407_v48 = vpop.f32.mrb[5].mxu0  ;;  %v2121_v45 = vpop.f32.mrb[1].mxu1 }
  0xe3   :  { %v650_v51 = vmax.f32 %v407_v48, 0.0  ;;  %v1653_v52 = vpop.f32.mrb[6].mxu0  ;;  %v1017_v48 = vld [vmem:[%s2592_s2 + $0x60] sm:$0xff] }
  0xe4   :  { %v719_v54 = vsel %vm710_vm1, %v652_v47, -inf  ;;  %v786_v55 = vadd.f32 %v785_v50, %v784_v46  ;;  %v653_v56 = vmax.f32 %v1653_v52, 0.0  ;;  %v410_v57 = vpop.f32.mrb[7].mxu0  ;;  %v791_v8 = vsel %vm710_vm1, %v652_v47, 0.0  ;;  %v1013_v47 = vld [vmem:[%s2592_s2 + $0x40] sm:$0xff]  ;;  %v2130_v52 = vpop.f32.mrb[2].mxu1 }
  0xe5   :  { %v720_v58 = vmax.f32 %v713_v49, %v719_v54  ;;  %v715_v59 = vsel %vm710_vm1, %v650_v51, -inf  ;;  %v787_v60 = vsel %vm710_vm1, %v650_v51, 0.0  ;;  %v651_v61 = vmax.f32 %v410_v57, 0.0 }
  0xe6   :  { %v716_v63 = vmax.f32 %v711_v53, %v715_v59  ;;  %v788_v0 = vadd.f32 %v787_v60, %v786_v55  ;;  %v721_v1 = vsel %vm710_vm1, %v653_v56, -inf  ;;  %v793_v13 = vsel %vm710_vm1, %v653_v56, 0.0 }
  0xe7   :  { %v722_v3 = vmax.f32 %v714_v62, %v721_v1  ;;  %v717_v4 = vsel %vm710_vm1, %v651_v61, -inf  ;;  %v789_v5 = vsel %vm710_vm1, %v651_v61, 0.0  ;;  %v1712_v46 = vpack.c.bf16 %v1009_v39, %v1005_v34 }
  0xe8   :  { %v718_v6 = vmax.f32 %v712_v2, %v717_v4  ;;  %v790_v7 = vadd.f32 %v789_v5, %v788_v0  ;;  %v1714_v53 = vpack.c.bf16 %v1018_v41, %v1014_v40  ;;  %v1716_v59 = vpack.c.bf16 %v1017_v48, %v1013_v47  ;;  %v1026_v4 = vld [vmem:[%s2592_s2 + $0xa8] sm:$0xff] }
  0xe9   :  { %v1656_v9 = vpop.f32.mrb[8].mxu0  ;;  %1713 = vmatpush1.bf16.msra.mxu1 %v1712_v46 }
  0xea   :  { %v792_v10 = vadd.f32 %v791_v8, %v790_v7  ;;  %v656_v11 = vmax.f32 %v1656_v9, 0.0  ;;  %v423_v12 = vpop.f32.mrb[9].mxu0  ;;  %1715 = vmatprep.subr.bf16.mxu1 %v1714_v53  ;;  %v1021_v8 = vld [vmem:[%s2592_s2 + $0x80] sm:$0xff] }
  0xeb   :  { %v654_v14 = vmax.f32 %v423_v12, 0.0  ;;  %v1657_v15 = vpop.f32.mrb[10].mxu0  ;;  %v1025_v9 = vld [vmem:[%s2592_s2 + $0xa0] sm:$0xff] }
  0xec   :  { %v727_v16 = vsel %vm710_vm1, %v656_v11, -inf  ;;  %v794_v17 = vadd.f32 %v793_v13, %v792_v10  ;;  %v657_v18 = vmax.f32 %v1657_v15, 0.0  ;;  %v426_v19 = vpop.f32.mrb[11].mxu0  ;;  %v799_v35 = vsel %vm710_vm1, %v656_v11, 0.0 }
  0xed   :  { %v2087_v20 = vmax.f32 %v720_v58, %v727_v16  ;;  %v723_v21 = vsel %vm710_vm1, %v654_v14, -inf  ;;  %v795_v22 = vsel %vm710_vm1, %v654_v14, 0.0  ;;  %v655_v23 = vmax.f32 %v426_v19, 0.0  ;;  %v2133_v58 = vpop.f32.mrb[3].mxu1  ;;  %1717 = vmatpush1.bf16.msra.mxu1 %v1716_v59 }
  0xee   :  { %v2091_v24 = vmax.f32 %v716_v63, %v723_v21  ;;  %v796_v25 = vadd.f32 %v795_v22, %v794_v17  ;;  %v729_v26 = vsel %vm710_vm1, %v657_v18, -inf  ;;  %v801_v49 = vsel %vm710_vm1, %v657_v18, 0.0 }
  0xef   :  { %v2094_v27 = vmax.f32 %v722_v3, %v729_v26  ;;  %v725_v28 = vsel %vm710_vm1, %v655_v23, -inf  ;;  %v797_v29 = vsel %vm710_vm1, %v655_v23, 0.0  ;;  %v1022_v3 = vld [vmem:[%s2592_s2 + $0x88] sm:$0xff] }
  0xf0   :  { %v2098_v30 = vmax.f32 %v718_v6, %v725_v28  ;;  %v798_v31 = vadd.f32 %v797_v29, %v796_v25  ;;  %v1718_v15 = vpack.c.bf16 %v1026_v4, %v1022_v3 }
  0xf1   :  { %v1660_v36 = vpop.f32.mrb[12].mxu0 }
  0xf2   :  { %v800_v42 = vadd.f32 %v799_v35, %v798_v31  ;;  %v660_v43 = vmax.f32 %v1660_v36, 0.0  ;;  %v439_v44 = vpop.f32.mrb[13].mxu0  ;;  %1719 = vmatprep.subr.bf16.mxu1 %v1718_v15 }
  0xf3   :  { %v658_v50 = vmax.f32 %v439_v44, 0.0  ;;  %v1661_v51 = vpop.f32.mrb[14].mxu0 }
  0xf4   :  { %v735_v54 = vsel %vm710_vm1, %v660_v43, -inf  ;;  %v802_v55 = vadd.f32 %v801_v49, %v800_v42  ;;  %v661_v56 = vmax.f32 %v1661_v51, 0.0  ;;  %v442_v57 = vpop.f32.mrb[15].mxu0  ;;  %v807_v12 = vsel %vm710_vm1, %v660_v43, 0.0  ;;  %v2157_v14 = vpop.f32.mrb[4].mxu1 }
  0xf5   :  { %v736_v60 = vmax.f32 %v2087_v20, %v735_v54  ;;  %v731_v61 = vsel %vm710_vm1, %v658_v50, -inf  ;;  %v803_v62 = vsel %vm710_vm1, %v658_v50, 0.0  ;;  %v659_v63 = vmax.f32 %v442_v57, 0.0  ;;  %v2159_v19 = vpop.f32.mrb[5].mxu1 }
  0xf6   :  { %v732_v0 = vmax.f32 %v2091_v24, %v731_v61  ;;  %v804_v1 = vadd.f32 %v803_v62, %v802_v55  ;;  %v737_v2 = vsel %vm710_vm1, %v661_v56, -inf  ;;  %v1720_v20 = vpack.c.bf16 %v1025_v9, %v1021_v8  ;;  %v2162_v24 = vpop.f32.mrb[6].mxu1 }
  0xf7   :  { %v738_v5 = vmax.f32 %v2094_v27, %v737_v2  ;;  %v733_v6 = vsel %vm710_vm1, %v659_v63, -inf  ;;  %v805_v7 = vsel %vm710_vm1, %v659_v63, 0.0  ;;  %v809_v21 = vsel %vm710_vm1, %v661_v56, 0.0  ;;  %v2165_v29 = vpop.f32.mrb[7].mxu1 }
  0xf8   :  { %v734_v10 = vmax.f32 %v2098_v30, %v733_v6  ;;  %v806_v11 = vadd.f32 %v805_v7, %v804_v1  ;;  %1721 = vmatpush1.bf16.msra.mxu1 %v1720_v20 }
  0xf9   :  { %v1664_v13 = vpop.f32.mrb[16].mxu0 }
  0xfa   :  { %v808_v16 = vadd.f32 %v807_v12, %v806_v11  ;;  %v664_v17 = vmax.f32 %v1664_v13, 0.0  ;;  %v455_v18 = vpop.f32.mrb[17].mxu0 }
  0xfb   :  { %v662_v22 = vmax.f32 %v455_v18, 0.0  ;;  %v1665_v23 = vpop.f32.mrb[18].mxu0 }
  0xfc   :  { %v743_v25 = vsel %vm710_vm1, %v664_v17, -inf  ;;  %v810_v26 = vadd.f32 %v809_v21, %v808_v16  ;;  %v665_v27 = vmax.f32 %v1665_v23, 0.0  ;;  %v458_v28 = vpop.f32.mrb[19].mxu0  ;;  %v815_v43 = vsel %vm710_vm1, %v664_v17, 0.0 }
  0xfd   :  { %v744_v30 = vmax.f32 %v736_v60, %v743_v25  ;;  %v739_v31 = vsel %vm710_vm1, %v662_v22, -inf  ;;  %v811_v32 = vsel %vm710_vm1, %v662_v22, 0.0  ;;  %v663_v33 = vmax.f32 %v458_v28, 0.0 }
  0xfe   :  { %v740_v34 = vmax.f32 %v732_v0, %v739_v31  ;;  %v812_v35 = vadd.f32 %v811_v32, %v810_v26  ;;  %v745_v36 = vsel %vm710_vm1, %v665_v27, -inf  ;;  %v817_v49 = vsel %vm710_vm1, %v665_v27, 0.0 }
  0xff   :  { %v746_v38 = vmax.f32 %v738_v5, %v745_v36  ;;  %v741_v39 = vsel %vm710_vm1, %v663_v33, -inf  ;;  %v813_v40 = vsel %vm710_vm1, %v663_v33, 0.0 }
 0x100   :  { %v742_v41 = vmax.f32 %v734_v10, %v741_v39  ;;  %v814_v42 = vadd.f32 %v813_v40, %v812_v35 }
 0x101   :  { %v1668_v44 = vpop.f32.mrb[20].mxu0 }
 0x102   :  { %v816_v46 = vadd.f32 %v815_v43, %v814_v42  ;;  %v668_v47 = vmax.f32 %v1668_v44, 0.0  ;;  %v471_v48 = vpop.f32.mrb[21].mxu0 }
 0x103   :  { %v666_v50 = vmax.f32 %v471_v48, 0.0  ;;  %v1669_v51 = vpop.f32.mrb[22].mxu0 }
 0x104   :  { %v751_v53 = vsel %vm710_vm1, %v668_v47, -inf  ;;  %v818_v54 = vadd.f32 %v817_v49, %v816_v46  ;;  %v669_v55 = vmax.f32 %v1669_v51, 0.0  ;;  %v474_v56 = vpop.f32.mrb[23].mxu0  ;;  %v823_v6 = vsel %vm710_vm1, %v668_v47, 0.0 }
 0x105   :  { %v752_v57 = vmax.f32 %v744_v30, %v751_v53  ;;  %v747_v59 = vsel %vm710_vm1, %v666_v50, -inf  ;;  %v819_v60 = vsel %vm710_vm1, %v666_v50, 0.0  ;;  %v667_v61 = vmax.f32 %v474_v56, 0.0 }
 0x106   :  { %v748_v62 = vmax.f32 %v740_v34, %v747_v59  ;;  %v820_v63 = vadd.f32 %v819_v60, %v818_v54  ;;  %v753_v0 = vsel %vm710_vm1, %v669_v55, -inf  ;;  %v825_v11 = vsel %vm710_vm1, %v669_v55, 0.0 }
 0x107   :  { %v754_v1 = vmax.f32 %v746_v38, %v753_v0  ;;  %v749_v2 = vsel %vm710_vm1, %v667_v61, -inf  ;;  %v821_v3 = vsel %vm710_vm1, %v667_v61, 0.0 }
 0x108   :  { %v750_v4 = vmax.f32 %v742_v41, %v749_v2  ;;  %v822_v5 = vadd.f32 %v821_v3, %v820_v63 }
 0x109   :  { %v1672_v7 = vpop.f32.mrb[24].mxu0 }
 0x10a   :  { %v824_v8 = vadd.f32 %v823_v6, %v822_v5  ;;  %v672_v9 = vmax.f32 %v1672_v7, 0.0  ;;  %v487_v10 = vpop.f32.mrb[25].mxu0 }
 0x10b   :  { %v670_v12 = vmax.f32 %v487_v10, 0.0  ;;  %v1673_v13 = vpop.f32.mrb[26].mxu0 }
 0x10c   :  { %v759_v15 = vsel %vm710_vm1, %v672_v9, -inf  ;;  %v826_v16 = vadd.f32 %v825_v11, %v824_v8  ;;  %v673_v17 = vmax.f32 %v1673_v13, 0.0  ;;  %v490_v18 = vpop.f32.mrb[27].mxu0  ;;  %v831_v34 = vsel %vm710_vm1, %v672_v9, 0.0 }
 0x10d   :  { %v760_v20 = vmax.f32 %v752_v57, %v759_v15  ;;  %v755_v21 = vsel %vm710_vm1, %v670_v12, -inf  ;;  %v827_v22 = vsel %vm710_vm1, %v670_v12, 0.0  ;;  %v671_v23 = vmax.f32 %v490_v18, 0.0 }
 0x10e   :  { %v756_v25 = vmax.f32 %v748_v62, %v755_v21  ;;  %v828_v26 = vadd.f32 %v827_v22, %v826_v16  ;;  %v761_v27 = vsel %vm710_vm1, %v673_v17, -inf  ;;  %v833_v40 = vsel %vm710_vm1, %v673_v17, 0.0 }
 0x10f   :  { %v762_v28 = vmax.f32 %v754_v1, %v761_v27  ;;  %v757_v30 = vsel %vm710_vm1, %v671_v23, -inf  ;;  %v829_v31 = vsel %vm710_vm1, %v671_v23, 0.0 }
 0x110   :  { %v758_v32 = vmax.f32 %v750_v4, %v757_v30  ;;  %v830_v33 = vadd.f32 %v829_v31, %v828_v26 }
 0x111   :  { %v1676_v35 = vpop.f32.mrb[28].mxu0 }
 0x112   :  { %v832_v36 = vadd.f32 %v831_v34, %v830_v33  ;;  %v676_v38 = vmax.f32 %v1676_v35, 0.0  ;;  %v503_v39 = vpop.f32.mrb[29].mxu0 }
 0x113   :  { %v674_v41 = vmax.f32 %v503_v39, 0.0  ;;  %v1677_v42 = vpop.f32.mrb[30].mxu0 }
 0x114   :  { %v767_v43 = vsel %vm710_vm1, %v676_v38, -inf  ;;  %v834_v44 = vadd.f32 %v833_v40, %v832_v36  ;;  %v677_v46 = vmax.f32 %v1677_v42, 0.0  ;;  %v506_v47 = vpop.f32.mrb[31].mxu0  ;;  %v839_v62 = vsel %vm710_vm1, %v676_v38, 0.0 }
 0x115   :  { %v768_v48 = vmax.f32 %v760_v20, %v767_v43  ;;  %v763_v49 = vsel %vm710_vm1, %v674_v41, -inf  ;;  %v835_v50 = vsel %vm710_vm1, %v674_v41, 0.0  ;;  %v675_v51 = vmax.f32 %v506_v47, 0.0 }
 0x116   :  { %v764_v53 = vmax.f32 %v756_v25, %v763_v49  ;;  %v836_v54 = vadd.f32 %v835_v50, %v834_v44  ;;  %v769_v55 = vsel %vm710_vm1, %v677_v46, -inf  ;;  %v841_v4 = vsel %vm710_vm1, %v677_v46, 0.0 }
 0x117   :  { %v770_v56 = vmax.f32 %v762_v28, %v769_v55  ;;  %v765_v57 = vsel %vm710_vm1, %v675_v51, -inf  ;;  %v837_v59 = vsel %vm710_vm1, %v675_v51, 0.0 }
 0x118   :  { %v766_v60 = vmax.f32 %v758_v32, %v765_v57  ;;  %v838_v61 = vadd.f32 %v837_v59, %v836_v54 }
 0x119   :  { %v772_v63 = vmax.f32 %v768_v48, %v770_v56  ;;  %v1680_v0 = vpop.f32.mrb[32].mxu0 }
 0x11a   :  { %v771_v1 = vmax.f32 %v764_v53, %v766_v60  ;;  %v840_v2 = vadd.f32 %v839_v62, %v838_v61  ;;  %v519_v3 = vpop.f32.mrb[33].mxu0  ;;  %v680_v10 = vmax.f32 %v1680_v0, 0.0 }
 0x11b   :  { %v678_v5 = vmax.f32 %v519_v3, 0.0  ;;  %v1681_v6 = vpop.f32.mrb[34].mxu0 }
 0x11c   :  { %v2198_v7 = vmax.f32 %v771_v1, %v772_v63  ;;  %v2200_v8 = vadd.f32 %v841_v4, %v840_v2  ;;  %v522_v9 = vpop.f32.mrb[35].mxu0  ;;  %v681_v13 = vmax.f32 %v1681_v6, 0.0  ;;  %v928_v17 = vsel %vm710_vm1, %v680_v10, 0.0 }
 0x11d   :  { %v679_v11 = vmax.f32 %v522_v9, 0.0  ;;  %v925_v12 = vsel %vm710_vm1, %v678_v5, 0.0  ;;  %v858_v23 = vsel %vm710_vm1, %v680_v10, -inf  ;;  %v856_v28 = vsel %vm710_vm1, %v678_v5, -inf }
 0x11e   :  { %v930_v25 = vsel %vm710_vm1, %v681_v13, 0.0  ;;  %v859_v39 = vsel %vm710_vm1, %v681_v13, -inf }
 0x11f   :  { %v926_v15 = vsel %vm710_vm1, %v679_v11, 0.0  ;;  %v857_v43 = vsel %vm710_vm1, %v679_v11, -inf }
 0x120   :  { %v927_v16 = vadd.f32 %v926_v15, %v925_v12 }
 0x121   :  { %v1684_v18 = vpop.f32.mrb[36].mxu0 }
 0x122   :  { %v929_v20 = vadd.f32 %v928_v17, %v927_v16  ;;  %v684_v21 = vmax.f32 %v1684_v18, 0.0  ;;  %v535_v22 = vpop.f32.mrb[37].mxu0 }
 0x123   :  { %v682_v26 = vmax.f32 %v535_v22, 0.0  ;;  %v1685_v27 = vpop.f32.mrb[38].mxu0 }
 0x124   :  { %v864_v30 = vsel %vm710_vm1, %v684_v21, -inf  ;;  %v931_v31 = vadd.f32 %v930_v25, %v929_v20  ;;  %v685_v32 = vmax.f32 %v1685_v27, 0.0  ;;  %v538_v33 = vpop.f32.mrb[39].mxu0  ;;  %v936_v50 = vsel %vm710_vm1, %v684_v21, 0.0 }
 0x125   :  { %v865_v34 = vmax.f32 %v858_v23, %v864_v30  ;;  %v860_v35 = vsel %vm710_vm1, %v682_v26, -inf  ;;  %v932_v36 = vsel %vm710_vm1, %v682_v26, 0.0  ;;  %v683_v38 = vmax.f32 %v538_v33, 0.0 }
 0x126   :  { %v861_v40 = vmax.f32 %v856_v28, %v860_v35  ;;  %v933_v41 = vadd.f32 %v932_v36, %v931_v31  ;;  %v866_v42 = vsel %vm710_vm1, %v685_v32, -inf  ;;  %v938_v56 = vsel %vm710_vm1, %v685_v32, 0.0 }
 0x127   :  { %v867_v44 = vmax.f32 %v859_v39, %v866_v42  ;;  %v862_v46 = vsel %vm710_vm1, %v683_v38, -inf  ;;  %v934_v47 = vsel %vm710_vm1, %v683_v38, 0.0 }
 0x128   :  { %v863_v48 = vmax.f32 %v857_v43, %v862_v46  ;;  %v935_v49 = vadd.f32 %v934_v47, %v933_v41 }
 0x129   :  { %v1688_v51 = vpop.f32.mrb[40].mxu0 }
 0x12a   :  { %v937_v53 = vadd.f32 %v936_v50, %v935_v49  ;;  %v688_v54 = vmax.f32 %v1688_v51, 0.0  ;;  %v551_v55 = vpop.f32.mrb[41].mxu0 }
 0x12b   :  { %v686_v57 = vmax.f32 %v551_v55, 0.0  ;;  %v1689_v59 = vpop.f32.mrb[42].mxu0 }
 0x12c   :  { %v872_v60 = vsel %vm710_vm1, %v688_v54, -inf  ;;  %v939_v61 = vadd.f32 %v938_v56, %v937_v53  ;;  %v689_v62 = vmax.f32 %v1689_v59, 0.0  ;;  %v554_v63 = vpop.f32.mrb[43].mxu0  ;;  %v944_v15 = vsel %vm710_vm1, %v688_v54, 0.0 }
 0x12d   :  { %v873_v0 = vmax.f32 %v865_v34, %v872_v60  ;;  %v868_v1 = vsel %vm710_vm1, %v686_v57, -inf  ;;  %v940_v2 = vsel %vm710_vm1, %v686_v57, 0.0  ;;  %v687_v3 = vmax.f32 %v554_v63, 0.0 }
 0x12e   :  { %v869_v4 = vmax.f32 %v861_v40, %v868_v1  ;;  %v941_v5 = vadd.f32 %v940_v2, %v939_v61  ;;  %v874_v6 = vsel %vm710_vm1, %v689_v62, -inf  ;;  %v946_v21 = vsel %vm710_vm1, %v689_v62, 0.0 }
 0x12f   :  { %v875_v9 = vmax.f32 %v867_v44, %v874_v6  ;;  %v870_v10 = vsel %vm710_vm1, %v687_v3, -inf  ;;  %v942_v11 = vsel %vm710_vm1, %v687_v3, 0.0  ;;  %v704_v53 = vmax.f32 %v2110_v37, 0.0 }
 0x130   :  { %v871_v12 = vmax.f32 %v863_v48, %v870_v10  ;;  %v943_v13 = vadd.f32 %v942_v11, %v941_v5  ;;  %v702_v54 = vmax.f32 %v2121_v45, 0.0  ;;  %v705_v60 = vmax.f32 %v2130_v52, 0.0 }
 0x131   :  { %v1692_v16 = vpop.f32.mrb[44].mxu0  ;;  %v708_v10 = vmax.f32 %v2157_v14, 0.0  ;;  %v1029_v14 = vld [vmem:[%s2592_s2 + $0xc0] sm:$0xff] }
 0x132   :  { %v945_v17 = vadd.f32 %v944_v15, %v943_v13  ;;  %v692_v18 = vmax.f32 %v1692_v16, 0.0  ;;  %v567_v20 = vpop.f32.mrb[45].mxu0  ;;  %v904_v16 = vsel %vm710_vm1, %v704_v53, -inf  ;;  %v978_v45 = vsel %vm710_vm1, %v705_v60, 0.0 }
 0x133   :  { %v690_v22 = vmax.f32 %v567_v20, 0.0  ;;  %v1693_v23 = vpop.f32.mrb[46].mxu0  ;;  %v984_v37 = vsel %vm710_vm1, %v708_v10, 0.0 }
 0x134   :  { %v880_v25 = vsel %vm710_vm1, %v692_v18, -inf  ;;  %v947_v26 = vadd.f32 %v946_v21, %v945_v17  ;;  %v693_v27 = vmax.f32 %v1693_v23, 0.0  ;;  %v570_v28 = vpop.f32.mrb[47].mxu0  ;;  %v952_v43 = vsel %vm710_vm1, %v692_v18, 0.0 }
 0x135   :  { %v881_v30 = vmax.f32 %v873_v0, %v880_v25  ;;  %v876_v31 = vsel %vm710_vm1, %v690_v22, -inf  ;;  %v948_v32 = vsel %vm710_vm1, %v690_v22, 0.0  ;;  %v691_v33 = vmax.f32 %v570_v28, 0.0 }
 0x136   :  { %v877_v34 = vmax.f32 %v869_v4, %v876_v31  ;;  %v949_v35 = vadd.f32 %v948_v32, %v947_v26  ;;  %v882_v36 = vsel %vm710_vm1, %v693_v27, -inf  ;;  %v954_v49 = vsel %vm710_vm1, %v693_v27, 0.0 }
 0x137   :  { %v883_v38 = vmax.f32 %v875_v9, %v882_v36  ;;  %v878_v39 = vsel %vm710_vm1, %v691_v33, -inf  ;;  %v950_v40 = vsel %vm710_vm1, %v691_v33, 0.0  ;;  %v703_v4 = vmax.f32 %v2133_v58, 0.0 }
 0x138   :  { %v879_v41 = vmax.f32 %v871_v12, %v878_v39  ;;  %v951_v42 = vadd.f32 %v950_v40, %v949_v35  ;;  %v900_v58 = vsel %vm710_vm1, %v702_v54, -inf  ;;  %v906_v17 = vsel %vm710_vm1, %v705_v60, -inf }
 0x139   :  { %v1696_v44 = vpop.f32.mrb[48].mxu0  ;;  %v902_v22 = vsel %vm710_vm1, %v703_v4, -inf  ;;  %v706_v23 = vmax.f32 %v2159_v19, 0.0  ;;  %v912_v28 = vsel %vm710_vm1, %v708_v10, -inf  ;;  %v707_v35 = vmax.f32 %v2165_v29, 0.0 }
 0x13a   :  { %v953_v46 = vadd.f32 %v952_v43, %v951_v42  ;;  %v696_v47 = vmax.f32 %v1696_v44, 0.0  ;;  %v583_v48 = vpop.f32.mrb[49].mxu0 }
 0x13b   :  { %v694_v50 = vmax.f32 %v583_v48, 0.0  ;;  %v1697_v51 = vpop.f32.mrb[50].mxu0  ;;  %v908_v43 = vsel %vm710_vm1, %v706_v23, -inf }
 0x13c   :  { %v888_v55 = vsel %vm710_vm1, %v696_v47, -inf  ;;  %v955_v56 = vadd.f32 %v954_v49, %v953_v46  ;;  %v697_v57 = vmax.f32 %v1697_v51, 0.0  ;;  %v586_v59 = vpop.f32.mrb[51].mxu0  ;;  %v960_v13 = vsel %vm710_vm1, %v696_v47, 0.0 }
 0x13d   :  { %v889_v61 = vmax.f32 %v881_v30, %v888_v55  ;;  %v884_v62 = vsel %vm710_vm1, %v694_v50, -inf  ;;  %v956_v63 = vsel %vm710_vm1, %v694_v50, 0.0  ;;  %v695_v0 = vmax.f32 %v586_v59, 0.0 }
 0x13e   :  { %v885_v1 = vmax.f32 %v877_v34, %v884_v62  ;;  %v957_v2 = vadd.f32 %v956_v63, %v955_v56  ;;  %v890_v3 = vsel %vm710_vm1, %v697_v57, -inf  ;;  %v962_v25 = vsel %vm710_vm1, %v697_v57, 0.0 }
 0x13f   :  { %v891_v5 = vmax.f32 %v883_v38, %v890_v3  ;;  %v886_v6 = vsel %vm710_vm1, %v695_v0, -inf  ;;  %v958_v9 = vsel %vm710_vm1, %v695_v0, 0.0  ;;  %v709_v30 = vmax.f32 %v2162_v24, 0.0 }
 0x140   :  { %v887_v11 = vmax.f32 %v879_v41, %v886_v6  ;;  %v959_v12 = vadd.f32 %v958_v9, %v957_v2  ;;  %v910_v57 = vsel %vm710_vm1, %v707_v35, -inf  ;;  %v972_v63 = vsel %vm710_vm1, %v702_v54, 0.0 }
 0x141   :  { %v1700_v15 = vpop.f32.mrb[52].mxu0  ;;  %v914_v50 = vsel %vm710_vm1, %v709_v30, -inf  ;;  %v980_v54 = vsel %vm710_vm1, %v706_v23, 0.0  ;;  %v986_v52 = vsel %vm710_vm1, %v709_v30, 0.0 }
 0x142   :  { %v961_v18 = vadd.f32 %v960_v13, %v959_v12  ;;  %v700_v20 = vmax.f32 %v1700_v15, 0.0  ;;  %v599_v21 = vpop.f32.mrb[53].mxu0  ;;  %v976_v15 = vsel %vm710_vm1, %v704_v53, 0.0 }
 0x143   :  { %v698_v26 = vmax.f32 %v599_v21, 0.0  ;;  %v1701_v27 = vpop.f32.mrb[54].mxu0 }
 0x144   :  { %v896_v31 = vsel %vm710_vm1, %v700_v20, -inf  ;;  %v963_v32 = vadd.f32 %v962_v25, %v961_v18  ;;  %v701_v33 = vmax.f32 %v1701_v27, 0.0  ;;  %v602_v34 = vpop.f32.mrb[55].mxu0  ;;  %v968_v51 = vsel %vm710_vm1, %v700_v20, 0.0  ;;  %v1034_v27 = vld [vmem:[%s2592_s2 + $0xe8] sm:$0xff] }
 0x145   :  { %v897_v36 = vmax.f32 %v889_v61, %v896_v31  ;;  %v892_v19 = vsel %vm710_vm1, %v698_v26, -inf  ;;  %v964_v38 = vsel %vm710_vm1, %v698_v26, 0.0  ;;  %v699_v39 = vmax.f32 %v602_v34, 0.0  ;;  %v1030_v26 = vld [vmem:[%s2592_s2 + $0xc8] sm:$0xff]  ;;  %v1012_v34 = vld [vmem:[%s2592_s2 + $0x38] sm:$0xff] }
 0x146   :  { %v893_v40 = vmax.f32 %v885_v1, %v892_v19  ;;  %v965_v41 = vadd.f32 %v964_v38, %v963_v32  ;;  %v898_v42 = vsel %vm710_vm1, %v701_v33, -inf  ;;  %v970_v0 = vsel %vm710_vm1, %v701_v33, 0.0  ;;  %v1008_v33 = vld [vmem:[%s2592_s2 + $0x18] sm:$0xff] }
 0x147   :  { %v905_v24 = vmax.f32 %v897_v36, %v904_v16  ;;  %v899_v44 = vmax.f32 %v891_v5, %v898_v42  ;;  %v894_v46 = vsel %vm710_vm1, %v699_v39, -inf  ;;  %v966_v47 = vsel %vm710_vm1, %v699_v39, 0.0 }
 0x148   :  { %v901_v48 = vmax.f32 %v893_v40, %v900_v58  ;;  %v895_v29 = vmax.f32 %v887_v11, %v894_v46  ;;  %v967_v49 = vadd.f32 %v966_v47, %v965_v41  ;;  %v974_v11 = vsel %vm710_vm1, %v703_v4, 0.0 }
 0x149   :  { %v907_v55 = vmax.f32 %v899_v44, %v906_v17  ;;  %v913_v56 = vmax.f32 %v905_v24, %v912_v28  ;;  %v843_v17 = vrot.slane %v2200_v8, 4  ;;  %v982_v20 = vsel %vm710_vm1, %v707_v35, 0.0 }
 0x14a   :  { %v969_v59 = vadd.f32 %v968_v51, %v967_v49  ;;  %v903_v61 = vmax.f32 %v895_v29, %v902_v22  ;;  %v909_v62 = vmax.f32 %v901_v48, %v908_v43  ;;  %v1722_v10 = vpack.c.bf16 %v1034_v27, %v1030_v26  ;;  %v1251_v26 = vld [vmem:[%s2594_s4 + $0x98] sm:$0xff] }
 0x14b   :  { %v915_v1 = vmax.f32 %v907_v55, %v914_v50  ;;  %v844_v53 = vadd.f32 %v843_v17, %v2200_v8  ;;  %v1033_v8 = vld [vmem:[%s2592_s2 + $0xe0] sm:$0xff]  ;;  %v1894_v35 = vmov 0.0   ;;  %v1726_v36 = vpack.c.bf16 %v1012_v34, %v1008_v33  ;;  %v1036_v17 = vld [vmem:[%s2592_s2 + $0xf8] sm:$0xff]  ;;  %v1237_v34 = vld [vmem:[%s2594_s4 + $0x28] sm:$0xff] }
 0x14c   :  { %v971_v2 = vadd.f32 %v970_v0, %v969_v59  ;;  %v911_v3 = vmax.f32 %v903_v61, %v910_v57  ;;  %v1724_v31 = vpack.c.bf16 %v1033_v8, %v1029_v14  ;;  %1723 = vmatprep.subr.bf16.mxu1 %v1722_v10  ;;  %1127 = vmatprep.mubr.f32.mxu1 %v1894_v35  ;;  %v774_v24 = vrot.slane %v2198_v7, 4  ;;  %v1007_v59 = vld [vmem:[%s2592_s2 + $0x10] sm:$0xff]  ;;  %v1235_v8 = vld [vmem:[%s2594_s4 + $0x18] sm:$0xff]  ;;  %v1236_v33 = vld [vmem:[%s2594_s4 + $0x20] sm:$0xff] }
 0x14d   :  { %v917_v5 = vmax.f32 %v913_v56, %v915_v1  ;;  %v845_v25 = vrot.slane %v844_v53, 2  ;;  %v1011_v61 = vld [vmem:[%s2592_s2 + $0x30] sm:$0xff] }
 0x14e   :  { %v973_v6 = vadd.f32 %v972_v63, %v971_v2  ;;  %v916_v9 = vmax.f32 %v909_v62, %v911_v3  ;;  %1725 = vmatpush1.bf16.msra.mxu1 %v1724_v31  ;;  %v775_v46 = vmax.f32 %v2198_v7, %v774_v24  ;;  %v1016_v7 = vld [vmem:[%s2592_s2 + $0x58] sm:$0xff]  ;;  %v1728_v2 = vpack.c.bf16 %v1011_v61, %v1007_v59  ;;  %v1234_v10 = vld [vmem:[%s2594_s4 + $0x10] sm:$0xff]  ;;  %v1244_v61 = vld [vmem:[%s2594_s4 + $0x60] sm:$0xff] }
 0x14f   :  { %v846_v30 = vadd.f32 %v845_v25, %v844_v53  ;;  %1727 = vmatprep.subr.bf16.mxu1 %v1726_v36  ;;  %v1020_v62 = vld [vmem:[%s2592_s2 + $0x78] sm:$0xff]  ;;  %v1249_v53 = vld [vmem:[%s2594_s4 + $0x88] sm:$0xff]  ;;  %v1748_v31 = vpack.c.bf16 %v1235_v8, %v1234_v10  ;;  %v1284_v10 = vld [vmem:[%s2594_s4 + $0x1a0] sm:$0xff] }
 0x150   :  { %v975_v12 = vadd.f32 %v974_v11, %v973_v6  ;;  %v918_v13 = vmax.f32 %v916_v9, %v917_v5  ;;  %v776_v29 = vrot.slane %v775_v46, 2  ;;  %v1730_v5 = vpack.c.bf16 %v1020_v62, %v1016_v7  ;;  %v1015_v6 = vld [vmem:[%s2592_s2 + $0x50] sm:$0xff]  ;;  %v1233_v25 = vld [vmem:[%s2594_s4 + $0x8] sm:$0xff]  ;;  %v1255_v36 = vld [vmem:[%s2594_s4 + $0xb8] sm:$0xff] }
 0x151   :  { %v847_v38 = vrot.slane %v846_v30, 1  ;;  %v1019_v9 = vld [vmem:[%s2592_s2 + $0x70] sm:$0xff]  ;;  %v1245_v7 = vld [vmem:[%s2594_s4 + $0x68] sm:$0xff] }
 0x152   :  { %v977_v16 = vadd.f32 %v976_v15, %v975_v12  ;;  %v919_v43 = vrot.slane %v918_v13, 4  ;;  %v777_v50 = vmax.f32 %v775_v46, %v776_v29  ;;  %v1024_v12 = vld [vmem:[%s2592_s2 + $0x98] sm:$0xff]  ;;  %v1732_v15 = vpack.c.bf16 %v1019_v9, %v1015_v6  ;;  %v1241_v46 = vld [vmem:[%s2594_s4 + $0x48] sm:$0xff] }
 0x153   :  { %v848_v41 = vadd.f32 %v847_v38, %v846_v30  ;;  %v1253_v30 = vld [vmem:[%s2594_s4 + $0xa8] sm:$0xff]  ;;  %v1768_v62 = vpack.c.bf16 %v1245_v7, %v1244_v61  ;;  %v1291_v61 = vld [vmem:[%s2594_s4 + $0x1d8] sm:$0xff] }
 0x154   :  { %v979_v58 = vadd.f32 %v978_v45, %v977_v16  ;;  %v920_v44 = vmax.f32 %v918_v13, %v919_v43  ;;  %v778_v55 = vrot.slane %v777_v50, 1  ;;  %v1028_v13 = vld [vmem:[%s2592_s2 + $0xb8] sm:$0xff]  ;;  %v1023_v45 = vld [vmem:[%s2592_s2 + $0x90] sm:$0xff]  ;;  %v1281_v6 = vld [vmem:[%s2594_s4 + $0x188] sm:$0xff] }
 0x155   :  { %v850_v42 = vmul.f32 0.00390625, %v848_v41  ;;  %v1734_v16 = vpack.c.bf16 %v1028_v13, %v1024_v12  ;;  %v1256_v41 = vld [vmem:[%s2594_s4 + $0xc0] sm:$0xff]  ;;  %v1039_v12 = vlaneseq  ;;  %v1285_v8 = vld [vmem:[%s2594_s4 + $0x1a8] sm:$0xff] }
 0x156   :  { %v981_v18 = vadd.f32 %v980_v54, %v979_v58  ;;  %v921_v47 = vrot.slane %v920_v44, 2  ;;  %v779_v63 = vmax.f32 %v777_v50, %v778_v55  ;;  %v1027_v54 = vld [vmem:[%s2592_s2 + $0xb0] sm:$0xff]  ;;  %v1032_v58 = vld [vmem:[%s2592_s2 + $0xd8] sm:$0xff]  ;;  %v1260_v55 = vld [vmem:[%s2594_s4 + $0xe0] sm:$0xff] }
 0x157   :  { %v1242_v50 = vld [vmem:[%s2594_s4 + $0x50] sm:$0xff]  ;;  %v2460_v13 = vshrl.u32 %v1039_v12, 7 }
 0x158   :  { %v983_v4 = vadd.f32 %v982_v20, %v981_v18  ;;  %v922_v48 = vmax.f32 %v920_v44, %v921_v47  ;;  %v1736_v18 = vpack.c.bf16 %v1027_v54, %v1023_v45  ;;  %v1738_v20 = vpack.c.bf16 %v1036_v17, %v1032_v58  ;;  %v1240_v44 = vld [vmem:[%s2594_s4 + $0x40] sm:$0xff]  ;;  %v1258_v47 = vld [vmem:[%s2594_s4 + $0xd0] sm:$0xff] }
 0x159   :  { %v1760_v29 = vpack.c.bf16 %v1241_v46, %v1240_v44  ;;  %v1045_v45 = vsub.s32 1, %v2460_v13  ;;  %v1288_v44 = vld [vmem:[%s2594_s4 + $0x1c0] sm:$0xff]  ;;  %v1289_v46 = vld [vmem:[%s2594_s4 + $0x1c8] sm:$0xff] }
 0x15a   :  { %v985_v21 = vadd.f32 %v984_v37, %v983_v4  ;;  %v923_v49 = vrot.slane %v922_v48, 1  ;;  %v1031_v4 = vld [vmem:[%s2592_s2 + $0xd0] sm:$0xff] }
 0x15b   :  { %v1035_v37 = vld [vmem:[%s2592_s2 + $0xf0] sm:$0xff] }
 0x15c   :  { %v987_v22 = vadd.f32 %v986_v52, %v985_v21  ;;  %v924_v51 = vmax.f32 %v922_v48, %v923_v49  ;;  %v1248_v21 = vld [vmem:[%s2594_s4 + $0x80] sm:$0xff]  ;;  %v1740_v52 = vpack.c.bf16 %v1035_v37, %v1031_v4  ;;  %v1259_v48 = vld [vmem:[%s2594_s4 + $0xd8] sm:$0xff]  ;;  %v1265_v37 = vld [vmem:[%s2594_s4 + $0x108] sm:$0xff] }
 0x15d   :  { %v1762_v49 = vpack.c.bf16 %v1259_v48, %v1258_v47  ;;  %v1264_v4 = vld [vmem:[%s2594_s4 + $0x100] sm:$0xff] }
 0x15e   :  { %v988_v60 = vrot.slane %v987_v22, 4 }
 0x160   :  { %v989_v23 = vadd.f32 %v988_v60, %v987_v22  ;;  %v1742_v22 = vpack.c.bf16 %v1249_v53, %v1248_v21  ;;  %v1232_v60 = vld [vmem:[%s2594_s4] sm:$0xff]  ;;  %v1282_v53 = vld [vmem:[%s2594_s4 + $0x190] sm:$0xff] }
 0x161   :  { %v1744_v27 = vpack.c.bf16 %v1233_v25, %v1232_v60  ;;  %v1776_v25 = vpack.c.bf16 %v1265_v37, %v1264_v4  ;;  %v1278_v4 = vld [vmem:[%s2594_s4 + $0x170] sm:$0xff]  ;;  %v1279_v37 = vld [vmem:[%s2594_s4 + $0x178] sm:$0xff] }
 0x162   :  { %v990_v28 = vrot.slane %v989_v23, 2 }
 0x164   :  { %v991_v32 = vadd.f32 %v990_v28, %v989_v23  ;;  %v1250_v23 = vld [vmem:[%s2594_s4 + $0x90] sm:$0xff]  ;;  %v1252_v28 = vld [vmem:[%s2594_s4 + $0xa0] sm:$0xff] }
 0x165   :  { %v1746_v14 = vpack.c.bf16 %v1251_v26, %v1250_v23  ;;  %v1266_v26 = vld [vmem:[%s2594_s4 + $0x110] sm:$0xff] }
 0x166   :  { %v992_v19 = vrot.slane %v991_v32, 1 }
 0x168   :  { %v993_v39 = vadd.f32 %v992_v19, %v991_v32  ;;  %v1750_v32 = vpack.c.bf16 %v1253_v30, %v1252_v28  ;;  %v1752_v19 = vpack.c.bf16 %v1237_v34, %v1236_v33  ;;  %v1782_v30 = vpack.c.bf16 %v1285_v8, %v1284_v10  ;;  %v1269_v33 = vld [vmem:[%s2594_s4 + $0x128] sm:$0xff] }
 0x169   :  { %v1053_v34 = vsub.s32 3, %v2460_v13 }
 0x16a   :  { %v994_v40 = vmul.f32 0.00390625, %v993_v39  ;;  %v1238_v39 = vld [vmem:[%s2594_s4 + $0x30] sm:$0xff] }
 0x16c   :  { %996 = vrot.lane.b32.xlu0 %v994_v40, %s1895_s28  ;;  %v1239_v40 = vld [vmem:[%s2594_s4 + $0x38] sm:$0xff] }
 0x16d   :  { %v1756_v43 = vpack.c.bf16 %v1239_v40, %v1238_v39 }
 0x170   :  { %852 = vrot.lane.b32.xlu0 %v850_v42, %s1895_s28  ;;  %v1257_v42 = vld [vmem:[%s2594_s4 + $0xc8] sm:$0xff] }
 0x171   :  { %v1758_v24 = vpack.c.bf16 %v1257_v42, %v1256_v41  ;;  %v1270_v42 = vld [vmem:[%s2594_s4 + $0x130] sm:$0xff] }
 0x1de   :  { %v997_v56 = vpop.permute.xlu0 %996 }
 0x1df   :  { %v999_v57 = vsel %vm710_vm1, %v924_v51, %v997_v56  ;;  %v1243_v51 = vld [vmem:[%s2594_s4 + $0x58] sm:$0xff]  ;;  %v1261_v56 = vld [vmem:[%s2594_s4 + $0xe8] sm:$0xff] }
 0x1e0   :  { %v1001_v0 = vrot.slane %v999_v57, 7  ;;  %v1764_v57 = vpack.c.bf16 %v1243_v51, %v1242_v50  ;;  %v1766_v59 = vpack.c.bf16 %v1261_v56, %v1260_v55  ;;  %v1790_v51 = vpack.c.bf16 %v1289_v46, %v1288_v44  ;;  %v1272_v55 = vld [vmem:[%s2594_s4 + $0x140] sm:$0xff]  ;;  %v1273_v56 = vld [vmem:[%s2594_s4 + $0x148] sm:$0xff] }
 0x1e2   :  { %v853_v1 = vpop.permute.xlu0 %852 }
 0x1e3   :  { %v855_v3 = vsel %vm710_vm1, %v779_v63, %v853_v1  ;;  %v1262_v63 = vld [vmem:[%s2594_s4 + $0xf0] sm:$0xff] }
 0x1e4   :  { %v1004_v11 = vsel %vm1003_vm2, %v855_v3, %v1001_v0  ;;  %v1263_v0 = vld [vmem:[%s2594_s4 + $0xf8] sm:$0xff]  ;;  %v1246_v1 = vld [vmem:[%s2594_s4 + $0x70] sm:$0xff] }
 0x1e5   :  { %1538 = vmatmul.mubr.msk.f32.vlgmr.msra.gmra.mrb[8].mxu1 %vm1059_vm3, %v1004_v11  ;;  %v1247_v3 = vld [vmem:[%s2594_s4 + $0x78] sm:$0xff] }
 0x1e6   :  { %1729 = vmatpush1.bf16.msra.mxu1 %v1728_v2  ;;  %1198 = vmatprep.mubr.f32.mxu1 %v1894_v35  ;;  %v1254_v35 = vld [vmem:[%s2594_s4 + $0xb0] sm:$0xff]  ;;  %v1770_v2 = vpack.c.bf16 %v1263_v0, %v1262_v63  ;;  %v1772_v9 = vpack.c.bf16 %v1247_v3, %v1246_v1  ;;  %v1792_v63 = vpack.c.bf16 %v1273_v56, %v1272_v55  ;;  %v1275_v3 = vld [vmem:[%s2594_s4 + $0x158] sm:$0xff] }
 0x1e7   :  { %1731 = vmatprep.subr.bf16.mxu1 %v1730_v5  ;;  %v1754_v38 = vpack.c.bf16 %v1255_v36, %v1254_v35  ;;  %v1280_v5 = vld [vmem:[%s2594_s4 + $0x180] sm:$0xff]  ;;  %v1286_v35 = vld [vmem:[%s2594_s4 + $0x1b0] sm:$0xff]  ;;  %v1287_v36 = vld [vmem:[%s2594_s4 + $0x1b8] sm:$0xff] }
 0x1e8   :  { %v1786_v41 = vpack.c.bf16 %v1287_v36, %v1286_v35 }
 0x1ea   :  { %1733 = vmatpush1.bf16.msra.mxu1 %v1732_v15  ;;  %v1041_v15 = vsub.s32 0, %v2460_v13 }
 0x1eb   :  { %1735 = vmatprep.subr.bf16.mxu1 %v1734_v16  ;;  %v1037_v16 = vld [vmem:[%s2593_s3] sm:$0xf]  ;;  %s1897_s3 = smov [#allocation2]  }
 0x1ec   :  { %v1042_v54 = vrot.slane %v1037_v16, %v1041_v15  ;;  %v1046_v58 = vrot.slane %v1037_v16, %v1045_v45  ;;  %v1277_v45 = vld [vmem:[%s2594_s4 + $0x168] sm:$0xff]  ;;  %s1451_s30 = sshll.u32 %s1897_s3, 4  ;;  %s1452_s30 = int_to_ptr.vmem [resolvable:$true] %s1451_s30 }
 0x1ed   :  { %s1846_s8 = scalar_lea.vmem %s1452_s30, 128  ;;  %p1851_p1 = scmp.lt.s32.totalorder %s1452_s30, %s1452_s30 }
 0x1ee   :  { %1737 = vmatpush1.bf16.msra.mxu1 %v1736_v18  ;;  %p1847_p0 = scmp.ne.s32.totalorder %s1452_s30, %s1846_s8  ;;  %p1852_p2 = scmp.lt.s32.totalorder %s1846_s8, %s1846_s8 }
 0x1ef   :  { %1739 = vmatprep.subr.bf16.mxu1 %v1738_v20 }
 0x1f0   :  { %p1853_p3 = por %p1852_p2, %p1851_p1 }
 0x1f2   :  { %1741 = vmatpush1.bf16.msra.mxu1 %v1740_v52  ;;  %v1283_v52 = vld [vmem:[%s2594_s4 + $0x198] sm:$0xff]  ;;  %p1854_p4 = pnand %p1853_p3, %p1847_p0 }
 0x1f3   :  { %1743 = vmatprep.subr.bf16.mxu1 %v1742_v22  ;;  %v1778_v23 = vpack.c.bf16 %v1283_v52, %v1282_v53 }
 0x1f5   :  { %1539 = vmatmul.mubr.msk.f32.vlgmr.msra.gmra.mrb[10].mxu1 %vm1059_vm3, %v1004_v11  ;;  %v1774_v11 = vpack.c.bf16 %v1281_v6, %v1280_v5  ;;  %v1292_v6 = vld [vmem:[%s2594_s4 + $0x1e0] sm:$0xff] }
 0x1f6   :  { %1745 = vmatpush3.bf16.msra.mxu1 %v1744_v27  ;;  %v1267_v27 = vld [vmem:[%s2594_s4 + $0x118] sm:$0xff] }
 0x1f7   :  { %1747 = vmatprep.subr.bf16.mxu1 %v1746_v14  ;;  %v1780_v28 = vpack.c.bf16 %v1267_v27, %v1266_v26 }
 0x1fa   :  { %1749 = vmatpush3.bf16.msra.mxu1 %v1748_v31  ;;  %v1049_v31 = vsub.s32 2, %v2460_v13 }
 0x1fb   :  { %1751 = vmatprep.subr.bf16.mxu1 %v1750_v32  ;;  %v1268_v32 = vld [vmem:[%s2594_s4 + $0x120] sm:$0xff] }
 0x1fc   :  { %v1050_v40 = vrot.slane %v1037_v16, %v1049_v31 }
 0x1fe   :  { %1753 = vmatpush3.bf16.msra.mxu1 %v1752_v19  ;;  %v1784_v19 = vpack.c.bf16 %v1269_v33, %v1268_v32 }
 0x1ff   :  { %1755 = vmatprep.subr.bf16.mxu1 %v1754_v38  ;;  %v1896_v38 = vmov 1983009808  }
 0x200   :  { %v1216_v39 = vunpack.c.l.s4 %v1896_v38 }
 0x202   :  { %1757 = vmatpush3.bf16.msra.mxu1 %v1756_v43  ;;  %v1271_v43 = vld [vmem:[%s2594_s4 + $0x138] sm:$0xff] }
 0x203   :  { %1759 = vmatprep.subr.bf16.mxu1 %v1758_v24  ;;  %v1054_v24 = vrot.slane %v1037_v16, %v1053_v34  ;;  %v1788_v48 = vpack.c.bf16 %v1271_v43, %v1270_v42  ;;  %v1276_v16 = vld [vmem:[%s2594_s4 + $0x160] sm:$0xff] }
 0x206   :  { %1761 = vmatpush3.bf16.msra.mxu1 %v1760_v29  ;;  %v1217_v29 = vunpack.c.0.s8 %v1216_v39 }
 0x207   :  { %1763 = vmatprep.subr.bf16.mxu1 %v1762_v49 }
 0x208   :  { %v1220_v0 = vsub.s32 %v1217_v29, %v2460_v13 }
 0x20a   :  { %1765 = vmatpush3.bf16.msra.mxu1 %v1764_v57 }
 0x20b   :  { %1767 = vmatprep.subr.bf16.mxu1 %v1766_v59  ;;  %v1290_v59 = vld [vmem:[%s2594_s4 + $0x1d0] sm:$0xff] }
 0x20c   :  { %v1794_v1 = vpack.c.bf16 %v1291_v61, %v1290_v59 }
 0x20e   :  { %1769 = vmatpush3.bf16.msra.mxu1 %v1768_v62 }
 0x20f   :  { %1771 = vmatprep.subr.bf16.mxu1 %v1770_v2  ;;  %v1274_v2 = vld [vmem:[%s2594_s4 + $0x150] sm:$0xff] }
 0x212   :  { %1773 = vmatpush3.bf16.msra.mxu1 %v1772_v9  ;;  %v1293_v9 = vld [vmem:[%s2594_s4 + $0x1e8] sm:$0xff] }
 0x213   :  { %1775 = vmatprep.subr.bf16.mxu1 %v1774_v11  ;;  %v1796_v11 = vpack.c.bf16 %v1275_v3, %v1274_v2  ;;  %v1798_v15 = vpack.c.bf16 %v1293_v9, %v1292_v6 }
 0x2b8   :  { %v1129_v17 = vpop.f32.mrb[8].mxu1 }
 0x2b9   :  { %v1130_v18 = vadd.f32 %v1129_v17, %v1042_v54  ;;  %v1131_v20 = vpop.f32.mrb[9].mxu1  ;;  %v1294_v54 = vld [vmem:[%s2594_s4 + $0x1f0] sm:$0xff] }
 0x2ba   :  { %v1132_v21 = vadd.f32 %v1131_v20, %v1046_v58  ;;  %v1295_v58 = vld [vmem:[%s2594_s4 + $0x1f8] sm:$0xff] }
 0x2bb   :  { %v1205_v22 = vmax.f32 %v1130_v18, 0.0  ;;  %v1800_v18 = vpack.c.bf16 %v1277_v45, %v1276_v16  ;;  %v1802_v20 = vpack.c.bf16 %v1295_v58, %v1294_v54 }
 0x2bc   :  { %v1206_v60 = vmax.f32 %v1132_v21, 0.0  ;;  %v1804_v21 = vpack.c.bf16 %v1279_v37, %v1278_v4 }
 0x2be   :  { %v2485_v14 = vcombine.low %v1205_v22, %v1206_v60  ;;  %1367 = vmatprep.mubr.f32.mxu1 %v1206_v60 }
 0x2bf   :  { %1368 = vmatmul.mubr.f32.vlgmr.msra.gmra.mrb[12].mxu1 %v1205_v22 }
 0x2c0   :  { %1777 = vmatpush3.bf16.msra.mxu1 %v1776_v25  ;;  %v1221_v12 = vrot.slane %v2485_v14, %v1220_v0 }
 0x2c1   :  { %1779 = vmatprep.subr.bf16.mxu1 %v1778_v23 }
 0x2c4   :  { %1781 = vmatpush3.bf16.msra.mxu1 %v1780_v28 }
 0x2c5   :  { %1783 = vmatprep.subr.bf16.mxu1 %v1782_v30 }
 0x2c8   :  { %v1200_v47 = vpop.f32.mrb[10].mxu1  ;;  %1785 = vmatpush3.bf16.msra.mxu1 %v1784_v19 }
 0x2c9   :  { %v1201_v49 = vadd.f32 %v1200_v47, %v1050_v40  ;;  %v1202_v50 = vpop.f32.mrb[11].mxu1  ;;  %1787 = vmatprep.subr.bf16.mxu1 %v1786_v41 }
 0x2ca   :  { %v1203_v57 = vadd.f32 %v1202_v50, %v1054_v24 }
 0x2cb   :  { %v1207_v7 = vmax.f32 %v1201_v49, 0.0 }
 0x2cc   :  { %v1208_v62 = vmax.f32 %v1203_v57, 0.0  ;;  %1789 = vmatpush3.bf16.msra.mxu1 %v1788_v48 }
 0x2cd   :  { %1791 = vmatprep.subr.bf16.mxu1 %v1790_v51 }
 0x2ce   :  { %v1214_v5 = vcombine.low %v1207_v7, %v1208_v62  ;;  %1437 = vmatprep.mubr.f32.mxu1 %v1208_v62 }
 0x2d0   :  { %1793 = vmatpush3.bf16.msra.mxu1 %v1792_v63  ;;  %v1228_v13 = vrot.slane %v1214_v5, %v1220_v0 }
 0x2d1   :  { %1795 = vmatprep.subr.bf16.mxu1 %v1794_v1 }
 0x2d2   :  { %v1229_v17 = vcombine.low %v1221_v12, %v1228_v13 }
 0x2d4   :  { %1797 = vmatpush3.bf16.msra.mxu1 %v1796_v11  ;;  %1231 = vst [vmem:[#allocation2] sm:$0xff] %v1229_v17 }
 0x2d5   :  { %1799 = vmatprep.subr.bf16.mxu1 %v1798_v15 }
 0x2d8   :  { %1801 = vmatpush3.bf16.msra.mxu1 %v1800_v18 }
 0x2d9   :  { %1803 = vmatprep.subr.bf16.mxu1 %v1802_v20 }
 0x2dc   :  { %1805 = vmatpush3.bf16.msra.mxu1 %v1804_v21 }
 0x2df   :  { %1438 = vmatmul.mubr.f32.vlgmr.msra.gmra.mrb[14].mxu1 %v1207_v7 }
 0x2e0   :  { %1857 = shalt.err (!%p1854_p4)
}
 0x2e1   :  { %s1858_s10 = scalar_lea.hbm %s2596_s6, 128 }
 0x2e2   :  { %p1859_p5 = scmp.ne.s32.totalorder %s2596_s6, %s1858_s10  ;;  %p1862_p6 = scmp.lt.u32.totalorder %s1858_s10, %s2596_s6 }
 0x2e4   :  { %p1864_p7 = pnand %p1862_p6, %p1859_p5 }
 0x2e6   :  { %1867 = shalt.err (!%p1864_p7)
}
 0x2e7   :  { %1454 = dma.vmem_to_hbm [thread:$0]  %s1452_s30, 128, %s2596_s6, [#allocation3]   ;;  %v1540_v60 = vld [vmem:[%s2595_s5] ss:$0 sm:$0xff]  ;;  %vm1443_vm4 = vcmask 9216  }
 0x2e8   :  { %s1898_s17 = smov [#allocation4]  }
 0x2e9   :  { %s1461_s0 = sshll.u32 %s1898_s17, 4  ;;  %s1462_s0 = int_to_ptr.vmem [resolvable:$true] %s1461_s0 }
 0x2ea   :  { %s1868_s18 = scalar_lea.vmem %s1462_s0, 32  ;;  %p1873_p9 = scmp.lt.s32.totalorder %s1462_s0, %s1462_s0 }
 0x2eb   :  { %p1869_p8 = scmp.ne.s32.totalorder %s1462_s0, %s1868_s18  ;;  %p1874_p10 = scmp.lt.s32.totalorder %s1868_s18, %s1868_s18 }
 0x2ed   :  { %p1875_p11 = por %p1874_p10, %p1873_p9 }
 0x2ef   :  { %p1876_p12 = pnand %p1875_p11, %p1869_p8 }
 0x392   :  { %v1606_v53 = vpop.f32.mrb[12].mxu1 }
 0x393   :  { %v1607_v52 = vpop.f32.mrb[13].mxu1 }
 0x394   :  { %v1608_v22 = vadd.f32 %v1607_v52, %v1606_v53 }
 0x396   :  { %v1370_v26 = vadd.f32 %v1608_v22, %v1540_v60 }
 0x3b2   :  { %v1641_v25 = vpop.f32.mrb[14].mxu1 }
 0x3b3   :  { %v1642_v23 = vpop.f32.mrb[15].mxu1 }
 0x3b4   :  { %v1643_v27 = vadd.f32 %v1642_v23, %v1641_v25 }
 0x3b6   :  { %v1440_v14 = vadd.f32 %v1643_v27, %v1370_v26 }
 0x3b8   :  { %1444 = vst.msk [vmem:[#allocation4] sm:$0x3] %vm1443_vm4, %v1440_v14 }
 0x3b9   :  { %1879 = shalt.err (!%p1876_p12)
}
 0x3ba   :  { %s1880_s5 = scalar_lea.hbm %s2597_s7, 32 }
 0x3bb   :  { %p1881_p13 = scmp.ne.s32.totalorder %s2597_s7, %s1880_s5  ;;  %p1884_p0 = scmp.lt.u32.totalorder %s1880_s5, %s2597_s7 }
 0x3bd   :  { %p1886_p1 = pnand %p1884_p0, %p1881_p13 }
 0x3bf   :  { %1889 = shalt.err (!%p1886_p1)
}
 0x3c0   :  { %1464 = dma.vmem_to_hbm [thread:$0]  %s1462_s0, 32, %s2597_s7, [#allocation5]  }
 0x3c1   :  { %1890 = dma.done.wait [#allocation3], 128  }
 0x3c2   :  { %1891 = vsyncadd [#allocation3], 4294967168 }
 0x3c3   :  { %1892 = dma.done.wait [#allocation5], 32  }
 0x3c4   :  { %1893 = vsyncadd [#allocation5], 4294967264 }
 0x3c5   :  { %1471 = vsyncpa [#allocation3], 1 }
 0x3c6   :  { %1472 = vsyncpa [#allocation5], 1 }

</bundles_post_ra>
